<compile_context>
chip_gen: v7x
topology: tpu7x:2x2x1
jax: 0.10.0
libtpu: 0.0.40
codegen_flags: <defaults>
</compile_context>

<pallas_src>
import jax
import jax.numpy as jnp
from jax import lax
from jax.experimental import pallas as pl
from jax.experimental.pallas import tpu as pltpu


def _round_up(x, m):
    return ((x + m - 1) // m) * m


def edge_mlp_kernel(src_ref, dst_ref, edg_ref, bidx_ref, u_ref, w_ref, b_ref,
                    out_ref):
    dim = out_ref.shape[-1]
    tile_e = out_ref.shape[0]
    nb = u_ref.shape[0]                      # padded #graphs (multiple of 8)

    # Fused u[batch] gather: one_hot(batch) @ u  (no HBM materialization).
    bidx = bidx_ref[...]                                           # (tile_e, 1) i32
    graph_ids = lax.broadcasted_iota(jnp.int32, (tile_e, nb), 1)   # (tile_e, nb)
    one_hot = (graph_ids == bidx).astype(jnp.float32)              # (tile_e, nb)
    u_g = jnp.dot(one_hot, u_ref[...].astype(jnp.float32),
                  preferred_element_type=jnp.float32)              # (tile_e, dim)

    # Packed weight slab: [W0a; W0b; W0c; W0d; W1; W2], each (dim, dim).
    w00 = w_ref[0 * dim:1 * dim, :]
    w01 = w_ref[1 * dim:2 * dim, :]
    w02 = w_ref[2 * dim:3 * dim, :]
    w03 = w_ref[3 * dim:4 * dim, :]
    w1 = w_ref[4 * dim:5 * dim, :]
    w2 = w_ref[5 * dim:6 * dim, :]

    # Layer 0: concat([src, dest, edge, u_g]) @ W0 + b0 as 4 partial matmuls.
    h = (jnp.dot(src_ref[...].astype(jnp.float32), w00,
                 preferred_element_type=jnp.float32)
         + jnp.dot(dst_ref[...].astype(jnp.float32), w01,
                   preferred_element_type=jnp.float32)
         + jnp.dot(edg_ref[...].astype(jnp.float32), w02,
                   preferred_element_type=jnp.float32)
         + jnp.dot(u_g, w03, preferred_element_type=jnp.float32)
         + b_ref[0:1, :])
    h = jnp.maximum(h, 0.0)

    # Layer 1.
    h = jnp.dot(h, w1, preferred_element_type=jnp.float32) + b_ref[1:2, :]
    h = jnp.maximum(h, 0.0)

    # Layer 2.
    h = jnp.dot(h, w2, preferred_element_type=jnp.float32) + b_ref[2:3, :]
    h = jnp.maximum(h, 0.0)

    out_ref[...] = h.astype(out_ref.dtype)


def _choose_tile(num_edges, requested):
    """Multiple of 8, <= padded E, and >= 2 grid steps when there is enough work."""
    requested = max(8, _round_up(int(requested), 8))
    e_pad = _round_up(int(num_edges), 8)
    if e_pad <= 16:
        return e_pad
    half = max(8, _round_up(pl.cdiv(e_pad, 2), 8))
    return min(requested, half, e_pad)


def megnet_edge_model(src, dest, edge_attr, u, batch, params, *, tile_e=1024):
    """Pallas implementation of Megnet_EdgeModel.forward (eval mode, relu)."""
    E, dim = src.shape
    w0, b0, w1, b1, w2, b2 = params

    # Pack parameters into one weight slab and one bias slab.
    w_all = jnp.concatenate([w0, w1, w2], axis=0).astype(jnp.float32)  # (6*dim, dim)
    b_all = jnp.concatenate([b0, b1, b2], axis=0).astype(jnp.float32)  # (3, dim)

    # Per-edge graph index as a narrow [E, 1] int32 column (tiled with edges).
    bidx = batch.astype(jnp.int32).reshape(E, 1)

    # Pad the tiny global-state table so the one-hot contraction dim is a
    # multiple of 8; padded rows are never selected (batch < num_graphs).
    nb = u.shape[0]
    nb_pad = _round_up(nb, 8)
    u_pad = jnp.pad(u.astype(jnp.float32), ((0, nb_pad - nb), (0, 0)))

    tile = _choose_tile(E, tile_e)
    grid = (pl.cdiv(E, tile),)

    # VMEM budget: double-buffered edge tiles + resident params, with headroom.
    per_step = tile * (3 * dim * 4 + 4) + tile * dim * 4
    resident = (w_all.size + b_all.size + u_pad.size) * 4
    vmem_limit = int(min(max(2 * per_step + 2 * resident + (4 << 20), 8 << 20),
                         48 << 20))

    edge_map = lambda i: (i, 0)
    full_map = lambda i: (0, 0)

    return pl.pallas_call(
        edge_mlp_kernel,
        out_shape=jax.ShapeDtypeStruct((E, dim), src.dtype),
        grid_spec=pltpu.PrefetchScalarGridSpec(
            num_scalar_prefetch=0,
            grid=grid,
            in_specs=[
                pl.BlockSpec((tile, dim), edge_map),      # src tile
                pl.BlockSpec((tile, dim), edge_map),      # dest tile
                pl.BlockSpec((tile, dim), edge_map),      # edge_attr tile
                pl.BlockSpec((tile, 1), edge_map),        # per-edge graph index
                pl.BlockSpec((nb_pad, dim), full_map),    # u table (resident)
                pl.BlockSpec((6 * dim, dim), full_map),   # packed weights
                pl.BlockSpec((3, dim), full_map),         # packed biases
            ],
            out_specs=pl.BlockSpec((tile, dim), edge_map),
        ),
        compiler_params=pltpu.CompilerParams(
            dimension_semantics=("parallel",),
            vmem_limit_bytes=vmem_limit,
        ),
    )(src, dest, edge_attr, bidx, u_pad, w_all, b_all)


def make_params(key, dim):
    """Deterministic synthetic params: Linear(4*dim, dim), Linear(dim, dim) x2."""
    ks = jax.random.split(key, 6)
    scale0 = 1.0 / jnp.sqrt(4.0 * dim)
    scale = 1.0 / jnp.sqrt(1.0 * dim)
    w0 = jax.random.uniform(ks[0], (4 * dim, dim), jnp.float32, -scale0, scale0)
    b0 = jax.random.uniform(ks[1], (1, dim), jnp.float32, -scale0, scale0)
    w1 = jax.random.uniform(ks[2], (dim, dim), jnp.float32, -scale, scale)
    b1 = jax.random.uniform(ks[3], (1, dim), jnp.float32, -scale, scale)
    w2 = jax.random.uniform(ks[4], (dim, dim), jnp.float32, -scale, scale)
    b2 = jax.random.uniform(ks[5], (1, dim), jnp.float32, -scale, scale)
    return (w0, b0, w1, b1, w2, b2)


def reference_forward(src, dest, edge_attr, u, batch, params):
    """Pure-JAX reference mirroring the PyTorch forward (eval mode)."""
    w0, b0, w1, b1, w2, b2 = params
    comb = jnp.concatenate([src, dest, edge_attr, u[batch]], axis=1)
    out = jax.nn.relu(comb @ w0 + b0)
    out = jax.nn.relu(out @ w1 + b1)
    out = jax.nn.relu(out @ w2 + b2)
    return out


if __name__ == "__main__":
    dim = 32        # hidden feature size
    E = 64          # number of edges
    B = 2           # number of graphs in the batch

    key = jax.random.PRNGKey(0)
    k_src, k_dst, k_edge, k_u, k_param = jax.random.split(key, 5)

    src = jax.random.normal(k_src, (E, dim), jnp.float32)
    dest = jax.random.normal(k_dst, (E, dim), jnp.float32)
    edge_attr = jax.random.normal(k_edge, (E, dim), jnp.float32)
    u = jax.random.normal(k_u, (B, dim), jnp.float32)
    batch = jnp.concatenate(
        [jnp.zeros((E // 2,), jnp.int32), jnp.ones((E // 2,), jnp.int32)])

    params = make_params(k_param, dim)

    out = megnet_edge_model(src, dest, edge_attr, u, batch, params)
    out = jax.block_until_ready(out)

    ref = reference_forward(src, dest, edge_attr, u, batch, params)
    assert out.shape == (E, dim)
    assert jnp.allclose(out, ref, atol=1e-5, rtol=1e-5), "mismatch vs reference"

    print("KERNEL_OK")
</pallas_src>

<mosaic_0001>
module attributes {stable_mosaic.version = 11 : i64} {
  func.func @edge_mlp_kernel(%arg0: i32, %arg1: memref<32x32xf32, #tpu.memory_space<vmem>>, %arg2: memref<32x32xf32, #tpu.memory_space<vmem>>, %arg3: memref<32x32xf32, #tpu.memory_space<vmem>>, %arg4: memref<32x1xi32, #tpu.memory_space<vmem>>, %arg5: memref<8x32xf32, #tpu.memory_space<vmem>>, %arg6: memref<192x32xf32, #tpu.memory_space<vmem>>, %arg7: memref<3x32xf32, #tpu.memory_space<vmem>>, %arg8: memref<32x32xf32, #tpu.memory_space<vmem>>) attributes {dimension_semantics = [#tpu.dimension_semantics<parallel>], iteration_bounds = array<i64: 2>, scalar_prefetch = 0 : i64, scratch_operands = 0 : i64, tpu.core_type = #tpu.core_type<tc>, window_params = [{transform_indices = @transform_0, window_bounds = array<i64: 32, 32>}, {transform_indices = @transform_1, window_bounds = array<i64: 32, 32>}, {transform_indices = @transform_2, window_bounds = array<i64: 32, 32>}, {transform_indices = @transform_3, window_bounds = array<i64: 32, 1>}, {pipeline_mode = #tpu.pipeline_mode<synchronous>, transform_indices = @transform_4, window_bounds = array<i64: 8, 32>}, {pipeline_mode = #tpu.pipeline_mode<synchronous>, transform_indices = @transform_5, window_bounds = array<i64: 192, 32>}, {pipeline_mode = #tpu.pipeline_mode<synchronous>, transform_indices = @transform_6, window_bounds = array<i64: 3, 32>}, {transform_indices = @transform_7, window_bounds = array<i64: 32, 32>}]} {
    %c0 = arith.constant 0 : index
    %c0_0 = arith.constant 0 : index
    %0 = vector.load %arg4[%c0, %c0_0] : memref<32x1xi32, #tpu.memory_space<vmem>>, vector<32x1xi32>
    %1 = tpu.iota {dimensions = array<i32: 1>} : vector<32x8xi32>
    %2 = vector.broadcast %0 : vector<32x1xi32> to vector<32x8xi32>
    %3 = arith.cmpi eq, %1, %2 : vector<32x8xi32>
    %4 = arith.extui %3 : vector<32x8xi1> to vector<32x8xi32>
    %5 = arith.sitofp %4 : vector<32x8xi32> to vector<32x8xf32>
    %c0_1 = arith.constant 0 : index
    %c0_2 = arith.constant 0 : index
    %6 = vector.load %arg5[%c0_1, %c0_2] : memref<8x32xf32, #tpu.memory_space<vmem>>, vector<8x32xf32>
    %cst = arith.constant dense<0.000000e+00> : vector<32x32xf32>
    %7 = tpu.matmul %5, %6, %cst {dimension_numbers = #tpu.dot_dimension_numbers<[1], [0], [0], [1], [0, 0, 1, 1], [], []>} : vector<32x8xf32>, vector<8x32xf32>, vector<32x32xf32> -> vector<32x32xf32>
    %c0_3 = arith.constant 0 : index
    %c0_4 = arith.constant 0 : index
    %8 = vector.load %arg6[%c0_3, %c0_4] : memref<192x32xf32, #tpu.memory_space<vmem>>, vector<32x32xf32>
    %c32 = arith.constant 32 : index
    %c0_5 = arith.constant 0 : index
    %9 = vector.load %arg6[%c32, %c0_5] : memref<192x32xf32, #tpu.memory_space<vmem>>, vector<32x32xf32>
    %c64 = arith.constant 64 : index
    %c0_6 = arith.constant 0 : index
    %10 = vector.load %arg6[%c64, %c0_6] : memref<192x32xf32, #tpu.memory_space<vmem>>, vector<32x32xf32>
    %c96 = arith.constant 96 : index
    %c0_7 = arith.constant 0 : index
    %11 = vector.load %arg6[%c96, %c0_7] : memref<192x32xf32, #tpu.memory_space<vmem>>, vector<32x32xf32>
    %c128 = arith.constant 128 : index
    %c0_8 = arith.constant 0 : index
    %12 = vector.load %arg6[%c128, %c0_8] : memref<192x32xf32, #tpu.memory_space<vmem>>, vector<32x32xf32>
    %c160 = arith.constant 160 : index
    %c0_9 = arith.constant 0 : index
    %13 = vector.load %arg6[%c160, %c0_9] : memref<192x32xf32, #tpu.memory_space<vmem>>, vector<32x32xf32>
    %c0_10 = arith.constant 0 : index
    %c0_11 = arith.constant 0 : index
    %14 = vector.load %arg1[%c0_10, %c0_11] : memref<32x32xf32, #tpu.memory_space<vmem>>, vector<32x32xf32>
    %cst_12 = arith.constant dense<0.000000e+00> : vector<32x32xf32>
    %15 = tpu.matmul %14, %8, %cst_12 {dimension_numbers = #tpu.dot_dimension_numbers<[1], [0], [0], [1], [0, 0, 1, 1], [], []>} : vector<32x32xf32>, vector<32x32xf32>, vector<32x32xf32> -> vector<32x32xf32>
    %c0_13 = arith.constant 0 : index
    %c0_14 = arith.constant 0 : index
    %16 = vector.load %arg2[%c0_13, %c0_14] : memref<32x32xf32, #tpu.memory_space<vmem>>, vector<32x32xf32>
    %cst_15 = arith.constant dense<0.000000e+00> : vector<32x32xf32>
    %17 = tpu.matmul %16, %9, %cst_15 {dimension_numbers = #tpu.dot_dimension_numbers<[1], [0], [0], [1], [0, 0, 1, 1], [], []>} : vector<32x32xf32>, vector<32x32xf32>, vector<32x32xf32> -> vector<32x32xf32>
    %18 = arith.addf %15, %17 : vector<32x32xf32>
    %c0_16 = arith.constant 0 : index
    %c0_17 = arith.constant 0 : index
    %19 = vector.load %arg3[%c0_16, %c0_17] : memref<32x32xf32, #tpu.memory_space<vmem>>, vector<32x32xf32>
    %cst_18 = arith.constant dense<0.000000e+00> : vector<32x32xf32>
    %20 = tpu.matmul %19, %10, %cst_18 {dimension_numbers = #tpu.dot_dimension_numbers<[1], [0], [0], [1], [0, 0, 1, 1], [], []>} : vector<32x32xf32>, vector<32x32xf32>, vector<32x32xf32> -> vector<32x32xf32>
    %21 = arith.addf %18, %20 : vector<32x32xf32>
    %cst_19 = arith.constant dense<0.000000e+00> : vector<32x32xf32>
    %22 = tpu.matmul %7, %11, %cst_19 {dimension_numbers = #tpu.dot_dimension_numbers<[1], [0], [0], [1], [0, 0, 1, 1], [], []>} : vector<32x32xf32>, vector<32x32xf32>, vector<32x32xf32> -> vector<32x32xf32>
    %23 = arith.addf %21, %22 : vector<32x32xf32>
    %c0_20 = arith.constant 0 : index
    %c0_21 = arith.constant 0 : index
    %24 = vector.load %arg7[%c0_20, %c0_21] : memref<3x32xf32, #tpu.memory_space<vmem>>, vector<1x32xf32>
    %25 = vector.broadcast %24 : vector<1x32xf32> to vector<32x32xf32>
    %26 = arith.addf %23, %25 : vector<32x32xf32>
    %cst_22 = arith.constant 0.000000e+00 : f32
    %27 = vector.broadcast %cst_22 : f32 to vector<32x32xf32>
    %28 = arith.maximumf %26, %27 : vector<32x32xf32>
    %cst_23 = arith.constant dense<0.000000e+00> : vector<32x32xf32>
    %29 = tpu.matmul %28, %12, %cst_23 {dimension_numbers = #tpu.dot_dimension_numbers<[1], [0], [0], [1], [0, 0, 1, 1], [], []>} : vector<32x32xf32>, vector<32x32xf32>, vector<32x32xf32> -> vector<32x32xf32>
    %c1 = arith.constant 1 : index
    %c0_24 = arith.constant 0 : index
    %30 = vector.load %arg7[%c1, %c0_24] : memref<3x32xf32, #tpu.memory_space<vmem>>, vector<1x32xf32>
    %31 = vector.broadcast %30 : vector<1x32xf32> to vector<32x32xf32>
    %32 = arith.addf %29, %31 : vector<32x32xf32>
    %cst_25 = arith.constant 0.000000e+00 : f32
    %33 = vector.broadcast %cst_25 : f32 to vector<32x32xf32>
    %34 = arith.maximumf %32, %33 : vector<32x32xf32>
    %cst_26 = arith.constant dense<0.000000e+00> : vector<32x32xf32>
    %35 = tpu.matmul %34, %13, %cst_26 {dimension_numbers = #tpu.dot_dimension_numbers<[1], [0], [0], [1], [0, 0, 1, 1], [], []>} : vector<32x32xf32>, vector<32x32xf32>, vector<32x32xf32> -> vector<32x32xf32>
    %c2 = arith.constant 2 : index
    %c0_27 = arith.constant 0 : index
    %36 = vector.load %arg7[%c2, %c0_27] : memref<3x32xf32, #tpu.memory_space<vmem>>, vector<1x32xf32>
    %37 = vector.broadcast %36 : vector<1x32xf32> to vector<32x32xf32>
    %38 = arith.addf %35, %37 : vector<32x32xf32>
    %cst_28 = arith.constant 0.000000e+00 : f32
    %39 = vector.broadcast %cst_28 : f32 to vector<32x32xf32>
    %40 = arith.maximumf %38, %39 : vector<32x32xf32>
    %c0_29 = arith.constant 0 : index
    %c0_30 = arith.constant 0 : index
    %41 = vector.load %arg8[%c0_29, %c0_30] : memref<32x32xf32, #tpu.memory_space<vmem>>, vector<32x32xf32>
    tpu.vector_store %arg8[%c0_29, %c0_30], %40 {strides = array<i32>} : memref<32x32xf32, #tpu.memory_space<vmem>>, vector<32x32xf32>,
    return
  }
  func.func @transform_0(%arg0: i32) -> (i32, i32) {
    %c0_i32 = arith.constant 0 : i32
    %c0_i32_0 = arith.constant 0 : i32
    return %arg0, %c0_i32 : i32, i32
  }
  func.func @transform_1(%arg0: i32) -> (i32, i32) {
    %c0_i32 = arith.constant 0 : i32
    %c0_i32_0 = arith.constant 0 : i32
    return %arg0, %c0_i32 : i32, i32
  }
  func.func @transform_2(%arg0: i32) -> (i32, i32) {
    %c0_i32 = arith.constant 0 : i32
    %c0_i32_0 = arith.constant 0 : i32
    return %arg0, %c0_i32 : i32, i32
  }
  func.func @transform_3(%arg0: i32) -> (i32, i32) {
    %c0_i32 = arith.constant 0 : i32
    %c0_i32_0 = arith.constant 0 : i32
    return %arg0, %c0_i32 : i32, i32
  }
  func.func @transform_4(%arg0: i32) -> (i32, i32) {
    %c0_i32 = arith.constant 0 : i32
    %c0_i32_0 = arith.constant 0 : i32
    %c0_i32_1 = arith.constant 0 : i32
    return %c0_i32, %c0_i32_0 : i32, i32
  }
  func.func @transform_5(%arg0: i32) -> (i32, i32) {
    %c0_i32 = arith.constant 0 : i32
    %c0_i32_0 = arith.constant 0 : i32
    %c0_i32_1 = arith.constant 0 : i32
    return %c0_i32, %c0_i32_0 : i32, i32
  }
  func.func @transform_6(%arg0: i32) -> (i32, i32) {
    %c0_i32 = arith.constant 0 : i32
    %c0_i32_0 = arith.constant 0 : i32
    %c0_i32_1 = arith.constant 0 : i32
    return %c0_i32, %c0_i32_0 : i32, i32
  }
  func.func @transform_7(%arg0: i32) -> (i32, i32) {
    %c0_i32 = arith.constant 0 : i32
    %c0_i32_0 = arith.constant 0 : i32
    return %arg0, %c0_i32 : i32, i32
  }
}

</mosaic_0001>

<bundles_post_ra>
// kernel: tpu_custom_call.1
= control target key start
LH: loop header
LB: loop body
LE: loop exit
PB: predicated region body
PF: predicated region fallthrough
CT: control target
= control target key end

     0   :  { %s1550_s24 = smov 0   ;;  %s1699_s0 = inlined_call_operand.vmem [shape: f32[64,32], index: 0, kind: input, shape index: {}]   ;;  %s1700_s1 = inlined_call_operand.vmem [shape: f32[64,32], index: 1, kind: input, shape index: {}]   ;;  %s1701_s2 = inlined_call_operand.vmem [shape: f32[64,32], index: 2, kind: input, shape index: {}]   ;;  %s1702_s3 = inlined_call_operand.vmem [shape: s32[64,1], index: 3, kind: input, shape index: {}]   ;;  %s1703_s4 = inlined_call_operand.vmem [shape: f32[8,32], index: 4, kind: input, shape index: {}]   ;;  %s1704_s5 = inlined_call_operand.vmem [shape: f32[192,32], index: 5, kind: input, shape index: {}]   ;;  %s1705_s6 = inlined_call_operand.vmem [shape: f32[3,32], index: 6, kind: input, shape index: {}]   ;;  %s1706_s7 = inlined_call_operand.vmem [shape: f32[64,32], index: 7, kind: output, shape index: {}]  }
   0x1 LB: > { %s1231_s25 = sadd.s32 4294967295, %s1506_s24   ;;  %p1235_p0 = scmp.ge.s32.totalorder %s1506_s24, 1  ;;  %s1506_s24 = sphi %s1550_s24, %s17_s24  }
   0x2   : > { %p271_p1 = scmp.lt.s32.totalorder %s1506_s24, 3 }
   0x4   : > { %p272_p2 = pnand %p1235_p0, %p271_p1 }
   0x5   : > { %s1236_s26 = sshll.u32 (!%p272_p2), %s1231_s25, 2  ;;  %v1508_v0 = vmov (!%p272_p2), 0   ;;  %v378_v5 = vld [vmem:[%s1703_s4] sm:$0xff] (!%p272_p2)  ;;  %v478_v7 = vld [vmem:[%s1704_s5 + $0x8] sm:$0xff] (!%p272_p2)  ;;  %v479_v8 = vld [vmem:[%s1704_s5 + $0x10] sm:$0xff] (!%p272_p2)  ;;  %vm509_vm0 = vcmask (!%p272_p2), 261120   ;;  %v352_v35 = vlaneseq (!%p272_p2) }
   0x6   : > { %275 = sbr.rel (%p272_p2) target bundleno = 1025 (0x401), region = 48  ;;  %1499 = vset.pattern.permute.xlu1 (!%p272_p2), %v1508_v0  ;;  %1498 = vset.pattern.permute.xlu0 (!%p272_p2), %v1508_v0  ;;  %p319_p3 = scmp.lt.s32.totalorder (!%p272_p2), %s1236_s26, 7  ;;  %v477_v6 = vld [vmem:[%s1704_s5] sm:$0xff] (!%p272_p2)  ;;  %v480_v10 = vld [vmem:[%s1704_s5 + $0x18] sm:$0xff] (!%p272_p2)  ;;  %v486_v14 = vld [vmem:[%s1704_s5 + $0x48] sm:$0xff] (!%p272_p2)  ;;  %vm379_vm1 = vcmask (!%p272_p2), 64512  }
   0x7   : > { %1336 = vmatprep.subr.mxu0 (!%p272_p2), %v378_v5  ;;  %v1436_v9 = vpack.c.bf16 (!%p272_p2), %v478_v7, %v477_v6  ;;  %v1440_v12 = vpack.c.bf16 (!%p272_p2), %v480_v10, %v479_v8  ;;  %v485_v13 = vld [vmem:[%s1704_s5 + $0x40] sm:$0xff] (!%p272_p2)  ;;  %v482_v16 = vld [vmem:[%s1704_s5 + $0x28] sm:$0xff] (!%p272_p2)  ;;  %v487_v19 = vld [vmem:[%s1704_s5 + $0x50] sm:$0xff] (!%p272_p2)  ;;  %v353_v36 = vand.u32 (!%p272_p2), 127, %v352_v35  ;;  %v1509_v39 = vmov (!%p272_p2), 0.0  }
   0x8   : > { %1337 = vmatpush3.msra.mxu0 (!%p272_p2), %v378_v5  ;;  %v481_v15 = vld [vmem:[%s1704_s5 + $0x20] sm:$0xff] (!%p272_p2)  ;;  %v1444_v17 = vpack.c.bf16 (!%p272_p2), %v486_v14, %v485_v13  ;;  %v488_v20 = vld [vmem:[%s1704_s5 + $0x58] sm:$0xff] (!%p272_p2)  ;;  %v490_v25 = vld [vmem:[%s1704_s5 + $0x68] sm:$0xff] (!%p272_p2) }
   0x9   : > { %1437 = vmatprep.subr.bf16.mxu1 (!%p272_p2), %v1436_v9  ;;  %v1428_v18 = vpack.c.bf16 (!%p272_p2), %v482_v16, %v481_v15  ;;  %v1448_v23 = vpack.c.bf16 (!%p272_p2), %v488_v20, %v487_v19  ;;  %v489_v24 = vld [vmem:[%s1704_s5 + $0x60] sm:$0xff] (!%p272_p2)  ;;  %v491_v29 = vld [vmem:[%s1704_s5 + $0x70] sm:$0xff] (!%p272_p2)  ;;  %v492_v30 = vld [vmem:[%s1704_s5 + $0x78] sm:$0xff] (!%p272_p2) }
   0xa   : > { %1439 = vmatpush3.bf16.msra.mxu1 (!%p272_p2), %v1436_v9  ;;  %v1452_v28 = vpack.c.bf16 (!%p272_p2), %v490_v25, %v489_v24  ;;  %v1456_v33 = vpack.c.bf16 (!%p272_p2), %v492_v30, %v491_v29  ;;  %v483_v41 = vld [vmem:[%s1704_s5 + $0x30] sm:$0xff] (!%p272_p2)  ;;  %v484_v42 = vld [vmem:[%s1704_s5 + $0x38] sm:$0xff] (!%p272_p2)  ;;  %v493_v57 = vld [vmem:[%s1704_s5 + $0x80] sm:$0xff] (!%p272_p2) }
   0xb   : > { %1441 = vmatprep.subr.bf16.mxu1 (!%p272_p2), %v1440_v12  ;;  %1429 = vmatprep.subr.bf16.mxu0 (!%p272_p2), %v1428_v18  ;;  %v1432_v46 = vpack.c.bf16 (!%p272_p2), %v484_v42, %v483_v41  ;;  %v494_v58 = vld [vmem:[%s1704_s5 + $0x88] sm:$0xff] (!%p272_p2)  ;;  %v495_v62 = vld [vmem:[%s1704_s5 + $0x90] sm:$0xff] (!%p272_p2)  ;;  %v496_v63 = vld [vmem:[%s1704_s5 + $0x98] sm:$0xff] (!%p272_p2) }
   0xc   : > { %v1460_v60 = vpack.c.bf16 (!%p272_p2), %v494_v58, %v493_v57  ;;  %v1270_v7 = vld [vmem:[%s1705_s6] ss:$0 sm:$0xff] (!%p272_p2)  ;;  %v500_v24 = vld [vmem:[%s1704_s5 + $0xb8] sm:$0xff] (!%p272_p2) }
   0xd   : > { %s1708_s26 = smov (!%p319_p3, %s1236_s26), 7 }
   0xe   : > { %s1558_s27 = sshll.u32 %s1708_s26, 3  ;;  %1443 = vmatpush3.bf16.msra.mxu1 %v1440_v12 }
   0xf   : > { %s340_s30 = scalar_lea.vmem %s1702_s3, %s1558_s27  ;;  %s322_s18 = scalar_lea.vmem %s1699_s0, %s1558_s27  ;;  %1445 = vmatprep.subr.bf16.mxu1 %v1444_v17 }
  0x10   : > { %v350_v1 = vld [vmem:[%s340_s30 + $0x10] sm:$0xff]  ;;  %v348_v2 = vld [vmem:[%s340_s30] sm:$0xff]  ;;  %v351_v3 = vld [vmem:[%s340_s30 + $0x18] sm:$0xff]  ;;  %s334_s14 = scalar_lea.vmem %s1701_s2, %s1558_s27  ;;  %s328_s8 = scalar_lea.vmem %s1700_s1, %s1558_s27 }
  0x11   : > { %361 = vperm.xlu1 %1499, %v350_v1   ;;  %355 = vperm.xlu0 %1498, %v348_v2   ;;  %v349_v4 = vld [vmem:[%s340_s30 + $0x8] sm:$0xff]  ;;  %v501_v11 = vld [vmem:[%s322_s18] sm:$0xff]  ;;  %v503_v22 = vld [vmem:[%s322_s18 + $0x10] sm:$0xff]  ;;  %v1464_v1 = vpack.c.bf16 %v496_v63, %v495_v62  ;;  %s346_s12 = scalar_lea.vmem %s1706_s7, %s1558_s27 }
  0x12   : > { %1366 = vmatprep.mubr.msk.f32.mxu1 %vm509_vm0, %v501_v11  ;;  %v502_v21 = vld [vmem:[%s322_s18 + $0x8] sm:$0xff]  ;;  %v504_v26 = vld [vmem:[%s322_s18 + $0x18] sm:$0xff]  ;;  %v704_v27 = vld [vmem:[%s334_s14] sm:$0xff] }
  0x13   : > { %1367 = vmatmul.mubr.msk.f32.vlgmr.msra.gmra.mrb[0].mxu1 %vm509_vm0, %v502_v21  ;;  %v705_v31 = vld [vmem:[%s334_s14 + $0x8] sm:$0xff]  ;;  %v706_v32 = vld [vmem:[%s334_s14 + $0x10] sm:$0xff]  ;;  %v707_v34 = vld [vmem:[%s334_s14 + $0x18] sm:$0xff] }
  0x14   : > { %1447 = vmatpush3.bf16.msra.mxu1 %v1444_v17  ;;  %1369 = vmatprep.mubr.msk.f32.mxu1 %vm509_vm0, %v503_v22  ;;  %v505_v49 = vld [vmem:[%s328_s8] sm:$0xff]  ;;  %v506_v50 = vld [vmem:[%s328_s8 + $0x8] sm:$0xff]  ;;  %v507_v51 = vld [vmem:[%s328_s8 + $0x10] sm:$0xff] }
  0x15   : > { %364 = vperm.xlu1 %1499, %v351_v3   ;;  %358 = vperm.xlu0 %1498, %v349_v4   ;;  %v508_v52 = vld [vmem:[%s328_s8 + $0x18] sm:$0xff]  ;;  %v497_v3 = vld [vmem:[%s1704_s5 + $0xa0] sm:$0xff]  ;;  %v498_v4 = vld [vmem:[%s1704_s5 + $0xa8] sm:$0xff] }
  0x16   : > { %1449 = vmatprep.subr.bf16.mxu1 %v1448_v23  ;;  %v1468_v5 = vpack.c.bf16 %v498_v4, %v497_v3 }
  0x17   : > { %1370 = vmatmul.mubr.msk.f32.gmra.mrb[2].mxu1 %vm509_vm0, %v504_v26  ;;  %v1271_v26 = vld [vmem:[%s1705_s6 + $0x1] ss:$0 sm:$0xff] }
  0x18   : > { %1451 = vmatpush3.bf16.msra.mxu1 %v1448_v23  ;;  %1380 = vmatprep.mubr.msk.f32.mxu1 %vm509_vm0, %v704_v27  ;;  %v499_v23 = vld [vmem:[%s1704_s5 + $0xb0] sm:$0xff] }
  0x19   : > { %1453 = vmatprep.subr.bf16.mxu1 %v1452_v28  ;;  %v1472_v25 = vpack.c.bf16 %v500_v24, %v499_v23 }
  0x1b   : > { %1381 = vmatmul.mubr.msk.f32.vlgmr.msra.gmra.mrb[0].mxu1 %vm509_vm0, %v705_v31 }
  0x1c   : > { %1455 = vmatpush3.bf16.msra.mxu1 %v1452_v28  ;;  %1383 = vmatprep.mubr.msk.f32.mxu1 %vm509_vm0, %v706_v32 }
  0x1d   : > { %1457 = vmatprep.subr.bf16.mxu1 %v1456_v33 }
  0x1f   : > { %1384 = vmatmul.mubr.msk.f32.gmra.mrb[2].mxu1 %vm509_vm0, %v707_v34 }
  0x20   : > { %1459 = vmatpush3.bf16.msra.mxu1 %v1456_v33 }
  0x90   : > { %v362_v37 = vpop.permute.xlu1 %361  ;;  %v356_v38 = vpop.permute.xlu0 %355 }
  0x91   : > { %vm366_vm2 = vcmp.eq.s32.totalorder %v353_v36, %v356_v38  ;;  %vm368_vm3 = vcmp.eq.s32.totalorder %v353_v36, %v362_v37 }
  0x92   : > { %v1246_v40 = vsel %vm366_vm2, 1.0, %v1509_v39  ;;  %v1248_v45 = vsel %vm368_vm3, 1.0, %v1509_v39 }
  0x93   : > { %1338 = vmatprep.mubr.msk.f32.mxu0 %vm379_vm1, %v1246_v40 }
  0x94   : > { %v365_v43 = vpop.permute.xlu1 %364  ;;  %v359_v44 = vpop.permute.xlu0 %358 }
  0x95   : > { %vm367_vm4 = vcmp.eq.s32.totalorder %v353_v36, %v359_v44  ;;  %vm369_vm5 = vcmp.eq.s32.totalorder %v353_v36, %v365_v43 }
  0x96   : > { %v1247_v47 = vsel %vm367_vm4, 1.0, %v1509_v39  ;;  %v1249_v48 = vsel %vm369_vm5, 1.0, %v1509_v39  ;;  %v1276_v39 = vld [vmem:[%s1705_s6 + $0x2] ss:$0 sm:$0xff] }
  0x97   : > { %1339 = vmatmul.mubr.msk.f32.vlgmr.msra.gmra.mrb[0].mxu0 %vm379_vm1, %v1247_v47 }
  0x98   : > { %1341 = vmatprep.mubr.msk.f32.mxu0 %vm379_vm1, %v1248_v45  ;;  %1431 = vmatpush3.bf16.msra.mxu0 %v1428_v18 }
  0x99   : > { %1433 = vmatprep.subr.bf16.mxu0 %v1432_v46 }
  0x9b   : > { %1342 = vmatmul.mubr.msk.f32.gmra.mrb[2].mxu0 %vm379_vm1, %v1249_v48 }
  0x9c   : > { %1435 = vmatpush3.bf16.msra.mxu0 %v1432_v46  ;;  %1352 = vmatprep.mubr.msk.f32.mxu0 %vm509_vm0, %v505_v49 }
  0x9d   : > { %1461 = vmatprep.subr.bf16.mxu0 %v1460_v60 }
  0x9f   : > { %1353 = vmatmul.mubr.msk.f32.vlgmr.msra.gmra.mrb[4].mxu0 %vm509_vm0, %v506_v50 }
  0xa0   : > { %1355 = vmatprep.mubr.msk.f32.mxu0 %vm509_vm0, %v507_v51  ;;  %1463 = vmatpush3.bf16.msra.mxu0 %v1460_v60 }
  0xa1   : > { %1465 = vmatprep.subr.bf16.mxu0 %v1464_v1 }
  0xa3   : > { %1356 = vmatmul.mubr.msk.f32.gmra.mrb[6].mxu0 %vm509_vm0, %v508_v52 }
  0xa4   : > { %1467 = vmatpush3.bf16.msra.mxu0 %v1464_v1 }
  0xa5   : > { %1469 = vmatprep.subr.bf16.mxu0 %v1468_v5 }
 0x16a   : > { %v1340_v53 = vpop.f32.mrb[0].mxu0 }
 0x16b   : > { %v458_v54 = vpop.f32.mrb[1].mxu0 }
 0x16c   : > { %1394 = vmatprep.mubr.msk.f32.mxu1 %vm509_vm0, %v458_v54 }
 0x16d   : > { %1395 = vmatmul.mubr.msk.f32.vlgmr.msra.gmra.mrb[0].mxu1 %vm509_vm0, %v1340_v53 }
 0x16e   : > { %v1343_v55 = vpop.f32.mrb[2].mxu0 }
 0x16f   : > { %v468_v56 = vpop.f32.mrb[3].mxu0 }
 0x170   : > { %1397 = vmatprep.mubr.msk.f32.mxu1 %vm509_vm0, %v468_v56 }
 0x171   : > { %1398 = vmatmul.mubr.msk.f32.gmra.mrb[2].mxu1 %vm509_vm0, %v1343_v55 }
 0x172   : > { %v1354_v59 = vpop.f32.mrb[4].mxu0 }
 0x173   : > { %v588_v61 = vpop.f32.mrb[5].mxu0 }
 0x176   : > { %v1357_v0 = vpop.f32.mrb[6].mxu0 }
 0x177   : > { %v598_v2 = vpop.f32.mrb[7].mxu0 }
 0x240   : > { %v1396_v6 = vpop.f32.mrb[0].mxu1 }
 0x241   : > { %v1476_v8 = vadd.f32 %v1396_v6, %v1354_v59  ;;  %v887_v9 = vpop.f32.mrb[1].mxu1 }
 0x242   : > { %v1477_v10 = vadd.f32 %v887_v9, %v588_v61 }
 0x243   : > { %v916_v11 = vadd.f32 %v1476_v8, %v1270_v7 }
 0x244   : > { %v915_v12 = vadd.f32 %v1477_v10, %v1270_v7  ;;  %v1399_v13 = vpop.f32.mrb[2].mxu1 }
 0x245   : > { %v1478_v14 = vadd.f32 %v1399_v13, %v1357_v0  ;;  %v897_v15 = vpop.f32.mrb[3].mxu1  ;;  %v920_v18 = vmax.f32 %v916_v11, 0.0 }
 0x246   : > { %v919_v16 = vmax.f32 %v915_v12, 0.0  ;;  %v1479_v17 = vadd.f32 %v897_v15, %v598_v2 }
 0x247   : > { %v918_v19 = vadd.f32 %v1478_v14, %v1270_v7 }
 0x248   : > { %v917_v20 = vadd.f32 %v1479_v17, %v1270_v7  ;;  %1408 = vmatprep.mubr.msk.f32.mxu0 %vm509_vm0, %v919_v16 }
 0x249   : > { %1409 = vmatmul.mubr.msk.f32.vlgmr.msra.gmra.mrb[8].mxu0 %vm509_vm0, %v920_v18  ;;  %v922_v22 = vmax.f32 %v918_v19, 0.0 }
 0x24a   : > { %v921_v21 = vmax.f32 %v917_v20, 0.0  ;;  %1471 = vmatpush3.bf16.msra.mxu0 %v1468_v5 }
 0x24b   : > { %1473 = vmatprep.subr.bf16.mxu0 %v1472_v25 }
 0x24c   : > { %1411 = vmatprep.mubr.msk.f32.mxu0 %vm509_vm0, %v921_v21 }
 0x24d   : > { %1412 = vmatmul.mubr.msk.f32.gmra.mrb[10].mxu0 %vm509_vm0, %v922_v22 }
 0x24e   : > { %1475 = vmatpush3.bf16.msra.mxu0 %v1472_v25 }
 0x31c   : > { %v1410_v27 = vpop.f32.mrb[8].mxu0 }
 0x31d   : > { %v1012_v28 = vadd.f32 %v1410_v27, %v1271_v26  ;;  %v1006_v29 = vpop.f32.mrb[9].mxu0 }
 0x31e   : > { %v1007_v30 = vadd.f32 %v1271_v26, %v1006_v29 }
 0x31f   : > { %v1026_v33 = vmax.f32 %v1012_v28, 0.0 }
 0x320   : > { %v1025_v31 = vmax.f32 %v1007_v30, 0.0  ;;  %v1413_v32 = vpop.f32.mrb[10].mxu0 }
 0x321   : > { %v1022_v34 = vadd.f32 %v1413_v32, %v1271_v26  ;;  %v1016_v35 = vpop.f32.mrb[11].mxu0 }
 0x322   : > { %v1017_v36 = vadd.f32 %v1271_v26, %v1016_v35  ;;  %1422 = vmatprep.mubr.msk.f32.mxu0 %vm509_vm0, %v1025_v31 }
 0x323   : > { %1423 = vmatmul.mubr.msk.f32.vlgmr.msra.gmra.mrb[12].mxu0 %vm509_vm0, %v1026_v33  ;;  %v1028_v38 = vmax.f32 %v1022_v34, 0.0 }
 0x324   : > { %v1027_v37 = vmax.f32 %v1017_v36, 0.0 }
 0x326   : > { %1425 = vmatprep.mubr.msk.f32.mxu0 %vm509_vm0, %v1027_v37 }
 0x327   : > { %1426 = vmatmul.mubr.msk.f32.gmra.mrb[14].mxu0 %vm509_vm0, %v1028_v38 }
 0x3f6   : > { %v1424_v40 = vpop.f32.mrb[12].mxu0 }
 0x3f7   : > { %v1118_v41 = vadd.f32 %v1424_v40, %v1276_v39  ;;  %v1112_v42 = vpop.f32.mrb[13].mxu0 }
 0x3f8   : > { %v1113_v43 = vadd.f32 %v1276_v39, %v1112_v42 }
 0x3f9   : > { %v1132_v46 = vmax.f32 %v1118_v41, 0.0 }
 0x3fa   : > { %v1131_v44 = vmax.f32 %v1113_v43, 0.0  ;;  %v1427_v45 = vpop.f32.mrb[14].mxu0 }
 0x3fb   : > { %v1128_v47 = vadd.f32 %v1427_v45, %v1276_v39  ;;  %v1122_v48 = vpop.f32.mrb[15].mxu0  ;;  %1136 = vst.msk [vmem:[%s346_s12 + $0x8] sm:$0xff] %vm509_vm0, %v1132_v46 }
 0x3fc   : > { %1135 = vst.msk [vmem:[%s346_s12] sm:$0xff] %vm509_vm0, %v1131_v44  ;;  %v1123_v49 = vadd.f32 %v1276_v39, %v1122_v48 }
 0x3fd   : > { %v1134_v51 = vmax.f32 %v1128_v47, 0.0 }
 0x3fe   : > { %v1133_v50 = vmax.f32 %v1123_v49, 0.0 }
 0x3ff   : > { %1138 = vst.msk [vmem:[%s346_s12 + $0x18] sm:$0xff] %vm509_vm0, %v1134_v51 }
 0x400   : > { %1137 = vst.msk [vmem:[%s346_s12 + $0x10] sm:$0xff] %vm509_vm0, %v1133_v50 }
 0x401 PF: > { %s17_s24 = sadd.s32 1, %s1506_s24  }
 0x402   : > { %p14_p4 = scmp.ge.s32.totalorder %s17_s24, 4  }
 0x404   :  { %16 = sbr.rel (!%p14_p4) target bundleno = 1 (0x1), region = 87 }

</bundles_post_ra>
